<compile_context>
chip_gen: v6e
topology: v6e:2x2x1
jax: 0.10.0
libtpu: 0.0.40
codegen_flags: <defaults>
</compile_context>

<pallas_src>
import jax
import jax.numpy as jnp
from jax import lax
from jax.experimental import pallas as pl
from jax.experimental.pallas import tpu as pltpu


_SUBLANE = 8
_MAX_ROW_TILE = 4096


def _round_up(x, m):
    return (x + m - 1) // m * m


def _vmem_budget_bytes():
    """Per-generation VMEM budget: 3/4 of physical per-core VMEM (headroom for
    Mosaic internal scratch / semaphores / pipeline metadata)."""
    try:
        cap = int(pltpu.get_tpu_info().vmem_capacity_bytes)
    except Exception:
        cap = 64 * 1024 * 1024          # conservative: v7x per-core VMEM
    return (cap * 3) // 4               # 48 MiB on v7x, ~96 MiB on v5e/v6e


def _pick_row_tile(m_rows, k, n, io_itemsize, budget_bytes):
    """Largest row tile (multiple of 8, <= 4096) whose double-buffered x/out tiles
    plus the (double-buffered) resident weight/bias fit the VMEM budget, further
    capped at ceil(M/2) so the grid has >= 2 steps for v7x's two TensorCores."""
    elt = max(int(io_itemsize), 4)
    const_bytes = 2 * (n * k + n) * 4                    # weight + bias blocks (2 bufs)
    per_row = 2 * elt * (k + n)                          # x tile + out tile (2 bufs)
    tm_budget = max((budget_bytes - const_bytes) // per_row, _SUBLANE)
    tm_split = _round_up(pl.cdiv(m_rows, 2), _SUBLANE)   # keep >= 2 grid steps
    tm = min(int(tm_budget), tm_split, _MAX_ROW_TILE)
    tm = max((tm // _SUBLANE) * _SUBLANE, _SUBLANE)
    return tm


def _linear_relu_kernel(x_ref, w_ref, b_ref, o_ref):
    # x_ref: (tm, K)   w_ref: (N, K) (PyTorch layout)   b_ref: (1, N)   o_ref: (tm, N)
    y = lax.dot_general(
        x_ref[...], w_ref[...],
        dimension_numbers=(((1,), (1,)), ((), ())),      # contract K of x with K of W
        preferred_element_type=jnp.float32)
    y = y + b_ref[...].astype(jnp.float32)
    o_ref[...] = jnp.maximum(y, 0.0).astype(o_ref.dtype)


def spectrum_embedding_cosy(padded_spectra, weight, bias):
    """padded_spectra: (batch, seq, input_dim)
       weight:         (output_dim, input_dim)   (PyTorch nn.Linear layout)
       bias:           (output_dim,)
       returns:        (batch, seq, output_dim) = relu(x @ W.T + b)
    """
    B, S, K = padded_spectra.shape
    N, K_w = weight.shape
    assert K_w == K, "weight must be (output_dim, input_dim)"
    M = B * S

    budget = _vmem_budget_bytes()
    tm = _pick_row_tile(M, K, N, padded_spectra.dtype.itemsize, budget)
    grid_m = pl.cdiv(M, tm)                              # partial last block is masked

    x2d = padded_spectra.reshape(M, K)                   # free reshape, no HBM pass
    b2d = bias.reshape(1, N)

    io_elt = padded_spectra.dtype.itemsize
    need = (2 * (tm * K + tm * N) * io_elt
            + 2 * (N * K * weight.dtype.itemsize + N * bias.dtype.itemsize))
    vmem_limit = int(min(max(2 * need, 32 * 1024 * 1024), budget))

    out2d = pl.pallas_call(
        _linear_relu_kernel,
        out_shape=jax.ShapeDtypeStruct((M, N), padded_spectra.dtype),
        grid_spec=pltpu.PrefetchScalarGridSpec(
            num_scalar_prefetch=0,
            grid=(grid_m,),
            in_specs=[
                pl.BlockSpec((tm, K), lambda i: (i, 0)),   # row tile of x
                pl.BlockSpec((N, K), lambda i: (0, 0)),    # resident weight (no .T copy)
                pl.BlockSpec((1, N), lambda i: (0, 0)),    # resident bias
            ],
            out_specs=pl.BlockSpec((tm, N), lambda i: (i, 0)),
        ),
        compiler_params=pltpu.CompilerParams(
            dimension_semantics=("parallel",),              # shards rows across v7x TCs
            vmem_limit_bytes=vmem_limit,
        ),
    )(x2d, weight, b2d)

    return out2d.reshape(B, S, N)


if __name__ == "__main__":
    # Small shapes consistent with the module's forward:
    # padded_spectra: (batch=2, seq=8, input_dim=4), output_dim=32
    batch, seq, input_dim, output_dim = 2, 8, 4, 32

    key = jax.random.PRNGKey(0)
    kx, kw, kb = jax.random.split(key, 3)

    x = jax.random.normal(kx, (batch, seq, input_dim), dtype=jnp.float32)

    # Deterministic parameter init (mimicking nn.Linear uniform(-1/sqrt(in), 1/sqrt(in)))
    bound = 1.0 / jnp.sqrt(jnp.float32(input_dim))
    weight = jax.random.uniform(kw, (output_dim, input_dim), jnp.float32, -bound, bound)
    bias = jax.random.uniform(kb, (output_dim,), jnp.float32, -bound, bound)

    out = spectrum_embedding_cosy(x, weight, bias)
    out = jax.block_until_ready(out)

    # Reference check (plain JAX) to validate semantics.
    ref = jnp.maximum(jnp.einsum("bsk,nk->bsn", x, weight) + bias, 0.0)
    assert out.shape == (batch, seq, output_dim)
    assert jnp.allclose(out, ref, atol=1e-5, rtol=1e-5)

    print("KERNEL_OK")
</pallas_src>

<mosaic_0001>
module attributes {stable_mosaic.version = 11 : i64} {
  func.func @_linear_relu_kernel(%arg0: i32, %arg1: memref<8x4xf32, #tpu.memory_space<vmem>>, %arg2: memref<32x4xf32, #tpu.memory_space<vmem>>, %arg3: memref<1x32xf32, #tpu.memory_space<vmem>>, %arg4: memref<8x32xf32, #tpu.memory_space<vmem>>) attributes {dimension_semantics = [#tpu.dimension_semantics<parallel>], iteration_bounds = array<i64: 2>, scalar_prefetch = 0 : i64, scratch_operands = 0 : i64, tpu.core_type = #tpu.core_type<tc>, window_params = [{transform_indices = @transform_0, window_bounds = array<i64: 8, 4>}, {pipeline_mode = #tpu.pipeline_mode<synchronous>, transform_indices = @transform_1, window_bounds = array<i64: 32, 4>}, {pipeline_mode = #tpu.pipeline_mode<synchronous>, transform_indices = @transform_2, window_bounds = array<i64: 1, 32>}, {transform_indices = @transform_3, window_bounds = array<i64: 8, 32>}]} {
    %c0 = arith.constant 0 : index
    %c0_0 = arith.constant 0 : index
    %0 = vector.load %arg1[%c0, %c0_0] : memref<8x4xf32, #tpu.memory_space<vmem>>, vector<8x4xf32>
    %c0_1 = arith.constant 0 : index
    %c0_2 = arith.constant 0 : index
    %1 = vector.load %arg2[%c0_1, %c0_2] : memref<32x4xf32, #tpu.memory_space<vmem>>, vector<32x4xf32>
    %cst = arith.constant dense<0.000000e+00> : vector<8x32xf32>
    %2 = tpu.matmul %0, %1, %cst {dimension_numbers = #tpu.dot_dimension_numbers<[1], [1], [0], [0], [0, 0, 1, 0], [], []>} : vector<8x4xf32>, vector<32x4xf32>, vector<8x32xf32> -> vector<8x32xf32>
    %c0_3 = arith.constant 0 : index
    %c0_4 = arith.constant 0 : index
    %3 = vector.load %arg3[%c0_3, %c0_4] : memref<1x32xf32, #tpu.memory_space<vmem>>, vector<1x32xf32>
    %4 = vector.broadcast %3 : vector<1x32xf32> to vector<8x32xf32>
    %5 = arith.addf %2, %4 : vector<8x32xf32>
    %cst_5 = arith.constant 0.000000e+00 : f32
    %6 = vector.broadcast %cst_5 : f32 to vector<8x32xf32>
    %7 = arith.maximumf %5, %6 : vector<8x32xf32>
    %c0_6 = arith.constant 0 : index
    %c0_7 = arith.constant 0 : index
    %8 = vector.load %arg4[%c0_6, %c0_7] : memref<8x32xf32, #tpu.memory_space<vmem>>, vector<8x32xf32>
    tpu.vector_store %arg4[%c0_6, %c0_7], %7 {strides = array<i32>} : memref<8x32xf32, #tpu.memory_space<vmem>>, vector<8x32xf32>,
    return
  }
  func.func @transform_0(%arg0: i32) -> (i32, i32) {
    %c0_i32 = arith.constant 0 : i32
    %c0_i32_0 = arith.constant 0 : i32
    return %arg0, %c0_i32 : i32, i32
  }
  func.func @transform_1(%arg0: i32) -> (i32, i32) {
    %c0_i32 = arith.constant 0 : i32
    %c0_i32_0 = arith.constant 0 : i32
    %c0_i32_1 = arith.constant 0 : i32
    return %c0_i32, %c0_i32_0 : i32, i32
  }
  func.func @transform_2(%arg0: i32) -> (i32, i32) {
    %c0_i32 = arith.constant 0 : i32
    %c0_i32_0 = arith.constant 0 : i32
    %c0_i32_1 = arith.constant 0 : i32
    return %c0_i32, %c0_i32_0 : i32, i32
  }
  func.func @transform_3(%arg0: i32) -> (i32, i32) {
    %c0_i32 = arith.constant 0 : i32
    %c0_i32_0 = arith.constant 0 : i32
    return %arg0, %c0_i32 : i32, i32
  }
}

</mosaic_0001>

<bundles_post_ra>
// kernel: tpu_custom_call.1
= control target key start
LH: loop header
LB: loop body
LE: loop exit
PB: predicated region body
PF: predicated region fallthrough
CT: control target
= control target key end

     0   :  { %8 = vsyncpa [#allocation3], 0  ;;  %s605_s0 = inlined_call_operand.vmem [shape: f32[16,4], index: 0, kind: input, shape index: {}]   ;;  %s606_s1 = inlined_call_operand.vmem [shape: f32[32,4], index: 1, kind: input, shape index: {}]   ;;  %s607_s2 = inlined_call_operand.vmem [shape: f32[1,32], index: 2, kind: input, shape index: {}]   ;;  %s608_s3 = inlined_call_operand.hbm [shape: f32[16,32], index: 3, kind: output, shape index: {}]  }
   0x1   :  { %10 = vsyncpa [#allocation3 + $0x1], 0  ;;  %s498_s12 = smov 0   ;;  %s500_s13 = smov 0  }
   0x2   :  { %s502_s14 = smov 0   ;;  %s504_s15 = smov 0  }
   0x3 LB: > { %s519_s16 = sadd.s32 4294967295, %s473_s15   ;;  %s340_s17 = sadd.s32 4294967294, %s473_s15   ;;  %s473_s15 = sphi %s504_s15, %s614_s15   ;;  %s469_s14 = sphi %s502_s14, %s613_s14   ;;  %s465_s13 = sphi %s500_s13, %s612_s13   ;;  %s461_s12 = sphi %s498_s12, %s611_s12  }
   0x4   : > { %s523_s18 = sadd.s32 1, %s473_s15   ;;  %s91_s19 = sadd.s32 1, %s469_s14 }
   0x5   : > { %s88_s20 = ssub.s32 %s473_s15, %s523_s18  ;;  %p101_p0 = scmp.ne.s32.totalorder %s469_s14, %s465_s13 }
   0x6   : > { %p89_p1 = scmp.eq.s32.totalorder %s88_s20, 0  ;;  %p102_p2 = scmp.eq.s32.totalorder %s519_s16, 1 }
   0x7   : > { %p107_p3 = scmp.ne.s32.totalorder %s465_s13, %s461_s12  ;;  %p108_p4 = scmp.eq.s32.totalorder %s340_s17, 1 }
   0x8   : > { %s534_s21 = scalar_select %p89_p1, %s469_s14, %s91_s19  }
   0x9   : > { %p536_p5 = por %p102_p2, %p101_p0  ;;  %p540_p6 = por %p108_p4, %p107_p3 }
   0xa   : > { %p343_p7 = scmp.ge.s32.totalorder %s473_s15, 1  ;;  %p139_p8 = scmp.lt.s32.totalorder %s473_s15, 3 }
   0xc   : > { %p140_p9 = pnand %p343_p7, %p139_p8 }
   0xd   : > { %p162_p10 = scmp.lt.s32.totalorder (!%p140_p9), %s519_s16, 1  ;;  %s159_s10 = sand.u32 (!%p140_p9), 1, %s465_s13  }
   0xe   : > { %143 = sbr.rel (%p140_p9) target bundleno = 246 (0xf6), region = 32  ;;  %s344_s11 = sshll.u32 (!%p140_p9), %s159_s10, 3 }
   0xf   : > { %s353_s20 = sshll.u32 (!%p140_p9), %s519_s16, 7  ;;  %s161_s24 = scalar_lea.vmem (!%p140_p9), [#allocation2], %s344_s11 }
  0x10   : > { %s281_s25 = sshll.u32 (!%p140_p9), %s161_s24, 4  ;;  %s268_s29 = scalar_lea.sflag (!%p140_p9), [#allocation3], %s159_s10  ;;  %s282_s25 = int_to_ptr.vmem [resolvable:$true] %s281_s25 }
  0x11   : > { %s413_s30 = scalar_lea.vmem (!%p140_p9), %s282_s25, 128 }
  0x12   : > { %p414_p11 = scmp.ne.s32.totalorder (!%p140_p9), %s282_s25, %s413_s30 }
  0x13   : > { %v170_v0 = vld [vmem:[%s606_s1 + $0x18] sm:$0xff]  ;;  %vm178_vm0 = vcmask 31744   ;;  %v475_v1 = vmov 0.0   ;;  %vm476_vm1 = vmmov 0   ;;  %v169_v2 = vld [vmem:[%s606_s1 + $0x10] sm:$0xff]  ;;  %s163_s28 = scalar_select %p162_p10, %s519_s16, 1 }
  0x14   : > { %361 = vmatprep.subr.mxu0 %v475_v1  ;;  %369 = vmatprep.mubr.msk.f32.mxu0 %vm476_vm1, %v475_v1  ;;  %v168_v3 = vld [vmem:[%s606_s1 + $0x8] sm:$0xff]  ;;  %v167_v4 = vld [vmem:[%s606_s1] sm:$0xff]  ;;  %vm265_vm2 = vcmask 261120   ;;  %p415_p12 = pnand %p414_p11, %p536_p5 }
  0x15   : > { %362 = vmatpush3.xpose.msk.msra.mxu0 %vm178_vm0, %v170_v0  ;;  %s345_s4 = sshll.u32 %s163_s28, 3  ;;  %v346_v6 = vld [vmem:[%s607_s2] ss:$0 sm:$0xff]  ;;  %s279_s28 = scalar_lea.hbm %s608_s3, %s353_s20 }
  0x16   : > { %363 = vmatprep.subr.mxu0 %v475_v1  ;;  %s165_s9 = scalar_lea.vmem %s605_s0, %s345_s4  ;;  %p416_p13 = pneg %p415_p12 }
  0x17   : > { %v166_v5 = vld [vmem:[%s165_s9] sm:$0xff]  ;;  %s477_s4 = smov [#allocation2]  }
  0x18   : > { %s417_s16 = sshll.u32 %s477_s4, 4  ;;  %s418_s16 = int_to_ptr.vmem [resolvable:$false] %s417_s16 }
  0x19   : > { %364 = vmatpush3.xpose.msk.msra.mxu0 %vm178_vm0, %v169_v2  ;;  %s419_s5 = scalar_lea.vmem %s418_s16, 256  ;;  %p420_p0 = scmp.lt.s32.totalorder %s282_s25, %s418_s16 }
  0x1a   : > { %365 = vmatprep.subr.mxu0 %v475_v1  ;;  %p421_p1 = scmp.lt.s32.totalorder %s419_s5, %s413_s30 }
  0x1c   : > { %p422_p2 = por %p421_p1, %p420_p0 }
  0x1d   : > { %366 = vmatpush3.xpose.msk.msra.mxu0 %vm178_vm0, %v168_v3 }
  0x1e   : > { %367 = vmatprep.subr.mxu0 %v475_v1  ;;  %p423_p3 = pnand %p422_p2, %p416_p13 }
  0x21   : > { %368 = vmatpush3.xpose.msk.msra.mxu0 %vm178_vm0, %v167_v4 }
  0x24   : > { %370 = vmatmul.mubr.msk.f32.vlgmr.msra.gmra.mxu0 %vm178_vm0, %v166_v5 }
  0xe4   : > { %v260_v7 = vpop.f32.mrf.mxu0 }
  0xe5   : > { %v261_v8 = vadd.f32 %v346_v6, %v260_v7 }
  0xe6   : > { %v371_v9 = vpop.f32.mrf.mxu0 }
  0xe7   : > { %v264_v10 = vmax.f32 %v261_v8, 0.0 }
  0xe9   : > { %266 = vst.msk [vmem:[%s161_s24] sm:$0xff] %vm265_vm2, %v264_v10 }
  0xea   : > { %426 = shalt.err (!%p423_p3)
}
  0xeb   : > { %s427_s6 = scalar_lea.hbm %s279_s28, 128  ;;  %s431_s9 = scalar_lea.hbm %s608_s3, 256 }
  0xec   : > { %p428_p4 = scmp.ne.s32.totalorder %s279_s28, %s427_s6  ;;  %p432_p9 = scmp.lt.s32.totalorder %s279_s28, %s608_s3 }
  0xed   : > { %p433_p10 = scmp.lt.s32.totalorder %s431_s9, %s427_s6 }
  0xee   : > { %p429_p7 = pnand %p428_p4, %p536_p5 }
  0xef   : > { %p434_p11 = por %p433_p10, %p432_p9 }
  0xf0   : > { %p430_p8 = pneg %p429_p7 }
  0xf2   : > { %p435_p12 = pnand %p434_p11, %p430_p8 }
  0xf4   : > { %438 = shalt.err (!%p435_p12)
}
  0xf5   : > { %372 = dma.vmem_to_hbm [thread:$0]  (%p536_p5), %s282_s25, 128, %s279_s28, %s268_s29  }
  0xf6 PF: > { %p378_p13 = scmp.ge.s32.totalorder %s473_s15, 2  ;;  %s293_s17 = sand.u32 1, %s461_s12  }
  0xf7   : > { %s294_s19 = scalar_lea.sflag [#allocation3], %s293_s17 }
  0xf8   : > { %p375_p0 = pnand %p378_p13, %p540_p6 }
  0xfa   : > { %p376_p1 = pneg %p375_p0 }
  0xfc   : > { %456 = dma.done.wait (%p376_p1), %s294_s19, 128  }
  0xfd   : > { %458 = vsyncadd (%p376_p1), %s294_s19, 4294967168  ;;  %p13_p2 = scmp.ge.s32.totalorder %s523_s18, 4   ;;  %s611_s12 = smov %s465_s13 }
  0xfe   : > { %s612_s13 = smov %s469_s14  ;;  %s613_s14 = smov %s534_s21 }
  0xff   : > { %s614_s15 = smov %s523_s18  ;;  %15 = sbr.rel (!%p13_p2) target bundleno = 3 (0x3), region = 67 }
 0x104   :  { %299 = vsyncpa [#allocation3], 1 }
 0x105   :  { %301 = vsyncpa [#allocation3 + $0x1], 1 }

</bundles_post_ra>
